<compile_context>
chip_gen: v7x
topology: tpu7x:2x2x1
jax: 0.10.0
libtpu: 0.0.40
codegen_flags: <defaults>
</compile_context>

<pallas_src>
import math

import jax
import jax.numpy as jnp
from jax import lax
from jax.experimental import pallas as pl
from jax.experimental.pallas import tpu as pltpu

D_MODEL = 512
VOCAB = 1000

_ROW_UNROLL = 8  # rows gathered per fori_loop iteration (T is a multiple of 8)


def _embed_kernel(ids_ref, lut_ref, out_ref):
    # ids_ref: SMEM (N_pad,) int32  -- all token ids (scalar-prefetched).
    # lut_ref: VMEM (V, D) f32      -- pre-scaled table, resident across steps.
    # out_ref: VMEM (T, D) f32      -- dense output tile for this step.
    tile = out_ref.shape[0]
    base = pl.program_id(0) * tile

    def body(step, carry):
        t0 = step * _ROW_UNROLL
        for u in range(_ROW_UNROLL):            # manual unroll: 8 rows / iter
            t = t0 + u
            row = ids_ref[base + t]              # scalar read from SMEM
            out_ref[pl.ds(t, 1), :] = lut_ref[pl.ds(row, 1), :]
        return carry

    lax.fori_loop(0, tile // _ROW_UNROLL, body, 0)


def embeddings_forward(token_ids, lut, *, tile_tokens=2048):
    """token_ids: [B, S] integer ids; lut: [V, D] float table -> [B, S, D]."""
    B, S = token_ids.shape
    V, D = lut.shape
    N = B * S

    # Fold sqrt(d_model) into the table once (2 MB, one-time op) instead of
    # scaling every (T, D) output tile: (lut * s)[x] == lut[x] * s elementwise.
    lut_scaled = lut * jnp.asarray(math.sqrt(D), dtype=lut.dtype)

    # Tokens per grid step: multiple of 8 (f32 sublane), capped for tiny inputs.
    T = min(max(8, (int(tile_tokens) // 8) * 8), max(8, ((N + 7) // 8) * 8))
    num_tiles = pl.cdiv(N, T)
    N_pad = num_tiles * T

    # Ids live in SMEM (1-D, int32). Note: SMEM pads 1-D arrays to the next
    # power of two in bytes; fine for typical (B*S) token counts.
    ids_flat = token_ids.reshape(N).astype(jnp.int32)
    ids_flat = jnp.clip(ids_flat, 0, V - 1)      # bounds safety
    ids_flat = jnp.pad(ids_flat, (0, N_pad - N)) # padded tail gathers row 0

    out_flat = pl.pallas_call(
        _embed_kernel,
        out_shape=jax.ShapeDtypeStruct((N_pad, D), lut.dtype),
        grid_spec=pltpu.PrefetchScalarGridSpec(
            num_scalar_prefetch=1,               # ids -> SMEM, passed whole
            grid=(num_tiles,),
            in_specs=[
                # Full LUT, constant block index -> DMA'd once, stays resident.
                pl.BlockSpec((V, D), lambda i, ids: (0, 0)),
            ],
            out_specs=pl.BlockSpec((T, D), lambda i, ids: (i, 0)),
        ),
        compiler_params=pltpu.CompilerParams(
            dimension_semantics=("parallel",),    # disjoint output tiles
            vmem_limit_bytes=32 * 1024 * 1024,
        ),
    )(ids_flat, lut_scaled)

    return out_flat[:N].reshape(B, S, D)


if __name__ == "__main__":
    key = jax.random.PRNGKey(0)
    # nn.Embedding default init is N(0, 1); build the table deterministically.
    lut = jax.random.normal(key, (VOCAB, D_MODEL), dtype=jnp.float32)

    # Same token ids as the reference script's `x` Variable.
    x = jnp.array([[100, 2, 421, 508], [491, 998, 1, 221]], dtype=jnp.int32)

    out = embeddings_forward(x, lut)
    out = jax.block_until_ready(out)

    # Pure-JAX reference: lut[x] * sqrt(d_model)
    ref = jnp.take(lut, x, axis=0) * math.sqrt(D_MODEL)
    assert out.shape == (2, 4, D_MODEL), out.shape
    assert jnp.allclose(out, ref, rtol=2e-5, atol=1e-5), "mismatch vs reference"

    print("KERNEL_OK")
</pallas_src>

<mosaic_0001>
module attributes {stable_mosaic.version = 11 : i64} {
  func.func @_embed_kernel(%arg0: i32, %arg1: memref<8xi32, #tpu.memory_space<smem>>, %arg2: memref<1000x512xf32, #tpu.memory_space<vmem>>, %arg3: memref<8x512xf32, #tpu.memory_space<vmem>>) attributes {dimension_semantics = [#tpu.dimension_semantics<parallel>], iteration_bounds = array<i64: 1>, scalar_prefetch = 1 : i64, scratch_operands = 0 : i64, tpu.core_type = #tpu.core_type<tc>, window_params = [{pipeline_mode = #tpu.pipeline_mode<synchronous>, transform_indices = @transform_0, window_bounds = array<i64: 1000, 512>}, {transform_indices = @transform_1, window_bounds = array<i64: 8, 512>}]} {
    %c8_i32 = arith.constant 8 : i32
    %0 = arith.muli %arg0, %c8_i32 : i32
    %c0_i32 = arith.constant 0 : i32
    %c8_i32_0 = arith.constant 8 : i32
    %1 = arith.muli %c0_i32, %c8_i32_0 : i32
    %c0_i32_1 = arith.constant 0 : i32
    %2 = arith.addi %1, %c0_i32_1 : i32
    %3 = arith.addi %0, %2 : i32
    %4 = arith.index_cast %3 : i32 to index
    %5 = memref.load %arg1[%4] : memref<8xi32, #tpu.memory_space<smem>>
    %6 = arith.index_cast %5 : i32 to index
    %c0 = arith.constant 0 : index
    %7 = vector.load %arg2[%6, %c0] : memref<1000x512xf32, #tpu.memory_space<vmem>>, vector<1x512xf32>
    %8 = arith.index_cast %2 : i32 to index
    %c0_2 = arith.constant 0 : index
    %9 = vector.load %arg3[%8, %c0_2] : memref<8x512xf32, #tpu.memory_space<vmem>>, vector<1x512xf32>
    tpu.vector_store %arg3[%8, %c0_2], %7 {strides = array<i32>} : memref<8x512xf32, #tpu.memory_space<vmem>>, vector<1x512xf32>,
    %c1_i32 = arith.constant 1 : i32
    %10 = arith.addi %1, %c1_i32 : i32
    %11 = arith.addi %0, %10 : i32
    %12 = arith.index_cast %11 : i32 to index
    %13 = memref.load %arg1[%12] : memref<8xi32, #tpu.memory_space<smem>>
    %14 = arith.index_cast %13 : i32 to index
    %c0_3 = arith.constant 0 : index
    %15 = vector.load %arg2[%14, %c0_3] : memref<1000x512xf32, #tpu.memory_space<vmem>>, vector<1x512xf32>
    %16 = arith.index_cast %10 : i32 to index
    %c0_4 = arith.constant 0 : index
    %17 = vector.load %arg3[%16, %c0_4] : memref<8x512xf32, #tpu.memory_space<vmem>>, vector<1x512xf32>
    tpu.vector_store %arg3[%16, %c0_4], %15 {strides = array<i32>} : memref<8x512xf32, #tpu.memory_space<vmem>>, vector<1x512xf32>,
    %c2_i32 = arith.constant 2 : i32
    %18 = arith.addi %1, %c2_i32 : i32
    %19 = arith.addi %0, %18 : i32
    %20 = arith.index_cast %19 : i32 to index
    %21 = memref.load %arg1[%20] : memref<8xi32, #tpu.memory_space<smem>>
    %22 = arith.index_cast %21 : i32 to index
    %c0_5 = arith.constant 0 : index
    %23 = vector.load %arg2[%22, %c0_5] : memref<1000x512xf32, #tpu.memory_space<vmem>>, vector<1x512xf32>
    %24 = arith.index_cast %18 : i32 to index
    %c0_6 = arith.constant 0 : index
    %25 = vector.load %arg3[%24, %c0_6] : memref<8x512xf32, #tpu.memory_space<vmem>>, vector<1x512xf32>
    tpu.vector_store %arg3[%24, %c0_6], %23 {strides = array<i32>} : memref<8x512xf32, #tpu.memory_space<vmem>>, vector<1x512xf32>,
    %c3_i32 = arith.constant 3 : i32
    %26 = arith.addi %1, %c3_i32 : i32
    %27 = arith.addi %0, %26 : i32
    %28 = arith.index_cast %27 : i32 to index
    %29 = memref.load %arg1[%28] : memref<8xi32, #tpu.memory_space<smem>>
    %30 = arith.index_cast %29 : i32 to index
    %c0_7 = arith.constant 0 : index
    %31 = vector.load %arg2[%30, %c0_7] : memref<1000x512xf32, #tpu.memory_space<vmem>>, vector<1x512xf32>
    %32 = arith.index_cast %26 : i32 to index
    %c0_8 = arith.constant 0 : index
    %33 = vector.load %arg3[%32, %c0_8] : memref<8x512xf32, #tpu.memory_space<vmem>>, vector<1x512xf32>
    tpu.vector_store %arg3[%32, %c0_8], %31 {strides = array<i32>} : memref<8x512xf32, #tpu.memory_space<vmem>>, vector<1x512xf32>,
    %c4_i32 = arith.constant 4 : i32
    %34 = arith.addi %1, %c4_i32 : i32
    %35 = arith.addi %0, %34 : i32
    %36 = arith.index_cast %35 : i32 to index
    %37 = memref.load %arg1[%36] : memref<8xi32, #tpu.memory_space<smem>>
    %38 = arith.index_cast %37 : i32 to index
    %c0_9 = arith.constant 0 : index
    %39 = vector.load %arg2[%38, %c0_9] : memref<1000x512xf32, #tpu.memory_space<vmem>>, vector<1x512xf32>
    %40 = arith.index_cast %34 : i32 to index
    %c0_10 = arith.constant 0 : index
    %41 = vector.load %arg3[%40, %c0_10] : memref<8x512xf32, #tpu.memory_space<vmem>>, vector<1x512xf32>
    tpu.vector_store %arg3[%40, %c0_10], %39 {strides = array<i32>} : memref<8x512xf32, #tpu.memory_space<vmem>>, vector<1x512xf32>,
    %c5_i32 = arith.constant 5 : i32
    %42 = arith.addi %1, %c5_i32 : i32
    %43 = arith.addi %0, %42 : i32
    %44 = arith.index_cast %43 : i32 to index
    %45 = memref.load %arg1[%44] : memref<8xi32, #tpu.memory_space<smem>>
    %46 = arith.index_cast %45 : i32 to index
    %c0_11 = arith.constant 0 : index
    %47 = vector.load %arg2[%46, %c0_11] : memref<1000x512xf32, #tpu.memory_space<vmem>>, vector<1x512xf32>
    %48 = arith.index_cast %42 : i32 to index
    %c0_12 = arith.constant 0 : index
    %49 = vector.load %arg3[%48, %c0_12] : memref<8x512xf32, #tpu.memory_space<vmem>>, vector<1x512xf32>
    tpu.vector_store %arg3[%48, %c0_12], %47 {strides = array<i32>} : memref<8x512xf32, #tpu.memory_space<vmem>>, vector<1x512xf32>,
    %c6_i32 = arith.constant 6 : i32
    %50 = arith.addi %1, %c6_i32 : i32
    %51 = arith.addi %0, %50 : i32
    %52 = arith.index_cast %51 : i32 to index
    %53 = memref.load %arg1[%52] : memref<8xi32, #tpu.memory_space<smem>>
    %54 = arith.index_cast %53 : i32 to index
    %c0_13 = arith.constant 0 : index
    %55 = vector.load %arg2[%54, %c0_13] : memref<1000x512xf32, #tpu.memory_space<vmem>>, vector<1x512xf32>
    %56 = arith.index_cast %50 : i32 to index
    %c0_14 = arith.constant 0 : index
    %57 = vector.load %arg3[%56, %c0_14] : memref<8x512xf32, #tpu.memory_space<vmem>>, vector<1x512xf32>
    tpu.vector_store %arg3[%56, %c0_14], %55 {strides = array<i32>} : memref<8x512xf32, #tpu.memory_space<vmem>>, vector<1x512xf32>,
    %c7_i32 = arith.constant 7 : i32
    %58 = arith.addi %1, %c7_i32 : i32
    %59 = arith.addi %0, %58 : i32
    %60 = arith.index_cast %59 : i32 to index
    %61 = memref.load %arg1[%60] : memref<8xi32, #tpu.memory_space<smem>>
    %62 = arith.index_cast %61 : i32 to index
    %c0_15 = arith.constant 0 : index
    %63 = vector.load %arg2[%62, %c0_15] : memref<1000x512xf32, #tpu.memory_space<vmem>>, vector<1x512xf32>
    %64 = arith.index_cast %58 : i32 to index
    %c0_16 = arith.constant 0 : index
    %65 = vector.load %arg3[%64, %c0_16] : memref<8x512xf32, #tpu.memory_space<vmem>>, vector<1x512xf32>
    tpu.vector_store %arg3[%64, %c0_16], %63 {strides = array<i32>} : memref<8x512xf32, #tpu.memory_space<vmem>>, vector<1x512xf32>,
    %c1_i32_17 = arith.constant 1 : i32
    return
  }
  func.func @transform_0(%arg0: i32, %arg1: memref<8xi32, #tpu.memory_space<smem>>) -> (i32, i32) {
    %c0_i32 = arith.constant 0 : i32
    %c0_i32_0 = arith.constant 0 : i32
    %c0_i32_1 = arith.constant 0 : i32
    return %c0_i32, %c0_i32_0 : i32, i32
  }
  func.func @transform_1(%arg0: i32, %arg1: memref<8xi32, #tpu.memory_space<smem>>) -> (i32, i32) {
    %c0_i32 = arith.constant 0 : i32
    %c0_i32_0 = arith.constant 0 : i32
    return %arg0, %c0_i32 : i32, i32
  }
}

</mosaic_0001>

<bundles_post_ra>
// kernel: tpu_custom_call.1
= control target key start
LH: loop header
LB: loop body
LE: loop exit
PB: predicated region body
PF: predicated region fallthrough
CT: control target
= control target key end

     0   :  { %s381_s0 = inlined_call_operand.hbm [shape: s32[8], index: 0, kind: input, shape index: {}]   ;;  %s382_s1 = inlined_call_operand.hbm [shape: f32[1000,512], index: 1, kind: input, shape index: {}]   ;;  %s383_s2 = inlined_call_operand.hbm [shape: f32[8,512], index: 2, kind: output, shape index: {}]  }
   0x1   :  { %s218_s11 = scalar_lea.hbm %s381_s0, 16 }
   0x2   :  { %p219_p0 = scmp.ne.s32.totalorder %s381_s0, %s218_s11  ;;  %p222_p1 = scmp.lt.u32.totalorder %s218_s11, %s381_s0 }
   0x4   :  { %p224_p2 = pnand %p222_p1, %p219_p0 }
   0x6   :  { %227 = shalt.err (!%p224_p2)  }
   0x7   :  { %s278_s16 = smov [#allocation3]  }
   0x8   :  { %8 = dma.hbm_to_smem %s381_s0, 16, %s278_s16, [#allocation2] }
   0x9   :  { %272 = dma.done.wait [#allocation2], 16 }
   0xa   :  { %273 = vsyncadd [#allocation2], 4294967280 }
   0xb   :  { %10 = sfence }
   0xc   :  { %11 = vsyncpa [#allocation5], 0 }
   0xd   :  { %12 = vsyncpa [#allocation6], 0  ;;  %s279_s19 = smov [#allocation4]   ;;  %s228_s23 = scalar_lea.hbm %s382_s1, 64000 }
   0xe   :  { %s18_s20 = sshll.u32 %s279_s19, 4  ;;  %p229_p3 = scmp.ne.s32.totalorder %s382_s1, %s228_s23  ;;  %s19_s20 = int_to_ptr.vmem [resolvable:$true] %s18_s20 }
   0xf   :  { %p232_p4 = scmp.lt.u32.totalorder %s228_s23, %s382_s1 }
  0x11   :  { %p234_p5 = pnand %p232_p4, %p229_p3 }
  0x13   :  { %237 = shalt.err (!%p234_p5)
}
  0x14   :  { %s238_s0 = scalar_lea.vmem %s19_s20, 64000  ;;  %p243_p7 = scmp.lt.s32.totalorder %s19_s20, %s19_s20 }
  0x15   :  { %p239_p6 = scmp.ne.s32.totalorder %s19_s20, %s238_s0  ;;  %p244_p8 = scmp.lt.s32.totalorder %s238_s0, %s238_s0 }
  0x17   :  { %p245_p9 = por %p244_p8, %p243_p7 }
  0x19   :  { %p246_p10 = pnand %p245_p9, %p239_p6 }
  0x1b   :  { %249 = shalt.err (!%p246_p10)
}
  0x1c   :  { %s280_s28 = smov 512   ;;  %s281_s29 = smov 32  }
  0x1d   :  { %24 = dma.hbm_to_vmem [thread:$0]  %s382_s1, 64000, %s19_s20, [#allocation5], %s280_s28, %s280_s28, %s281_s29  }
  0x1e   :  { %274 = dma.done.wait [#allocation5], 64000  }
  0x1f   :  { %275 = vsyncadd [#allocation5], 4294903296  ;;  %s29_s4 = sld [smem:[#allocation3]]  ;;  %s184_s5 = sld [smem:[#allocation3 + $0x1]]  ;;  %v39_v0 = vlaneseq }
  0x20   :  { %s322_s6 = sld [smem:[#allocation3 + $0x2]]  ;;  %s324_s7 = sld [smem:[#allocation3 + $0x3]] }
  0x21   :  { %s326_s8 = sld [smem:[#allocation3 + $0x4]]  ;;  %s328_s9 = sld [smem:[#allocation3 + $0x5]]  ;;  %vm336_vm0 = vcmp.lt.s32.totalorder %v39_v0, 512 }
  0x22   :  { %s330_s10 = sld [smem:[#allocation3 + $0x6]]  ;;  %s332_s11 = sld [smem:[#allocation3 + $0x7]] }
  0x23   :  { %s282_s1 = smov [#allocation7]  }
  0x24   :  { %s334_s12 = sshll.u32 %s282_s1, 4  ;;  %s150_s12 = int_to_ptr.vmem [resolvable:$true] %s334_s12 }
  0x25   :  { %s30_s13 = sshra.s32 %s29_s4, 3  ;;  %s33_s14 = sand.u32 7, %s29_s4 }
  0x26   :  { %s205_s15 = sshll.u32 %s30_s13, 5  ;;  %s47_s16 = sshra.s32 %s184_s5, 3 }
  0x27   :  { %s36_s17 = sadd.s32 %s205_s15, %s33_s14  ;;  %s50_s18 = sand.u32 7, %s184_s5 }
  0x28   :  { %s206_s19 = sshll.u32 %s47_s16, 5  ;;  %s37_s20 = scalar_lea.vmem [#allocation4], %s36_s17 }
  0x29   :  { %v38_v2 = vld [vmem:[%s37_s20] ss:$8 sm:$0xf]  ;;  %s53_s21 = sadd.s32 %s206_s19, %s50_s18  ;;  %s61_s22 = sshra.s32 %s322_s6, 3 }
  0x2a   :  { %43 = vst.msk [vmem:[#allocation7] ss:$8 sm:$0xf] %vm336_vm0, %v38_v2  ;;  %s64_s23 = sand.u32 7, %s322_s6  ;;  %s54_s24 = scalar_lea.vmem [#allocation4], %s53_s21 }
  0x2b   :  { %v55_v3 = vld [vmem:[%s54_s24] ss:$8 sm:$0xf]  ;;  %s207_s25 = sshll.u32 %s61_s22, 5  ;;  %s75_s26 = sshra.s32 %s324_s7, 3 }
  0x2c   :  { %57 = vst.msk [vmem:[#allocation7 + $0x1] ss:$8 sm:$0xf] %vm336_vm0, %v55_v3  ;;  %s67_s27 = sadd.s32 %s207_s25, %s64_s23  ;;  %s78_s0 = sand.u32 7, %s324_s7 }
  0x2d   :  { %s208_s28 = sshll.u32 %s75_s26, 5  ;;  %s68_s29 = scalar_lea.vmem [#allocation4], %s67_s27 }
  0x2e   :  { %v69_v4 = vld [vmem:[%s68_s29] ss:$8 sm:$0xf]  ;;  %s81_s30 = sadd.s32 %s208_s28, %s78_s0  ;;  %s89_s3 = sshra.s32 %s326_s8, 3 }
  0x2f   :  { %71 = vst.msk [vmem:[#allocation7 + $0x2] ss:$8 sm:$0xf] %vm336_vm0, %v69_v4  ;;  %s92_s4 = sand.u32 7, %s326_s8  ;;  %s82_s5 = scalar_lea.vmem [#allocation4], %s81_s30 }
  0x30   :  { %v83_v5 = vld [vmem:[%s82_s5] ss:$8 sm:$0xf]  ;;  %s209_s6 = sshll.u32 %s89_s3, 5  ;;  %s103_s1 = sshra.s32 %s328_s9, 3 }
  0x31   :  { %85 = vst.msk [vmem:[#allocation7 + $0x3] ss:$8 sm:$0xf] %vm336_vm0, %v83_v5  ;;  %s95_s7 = sadd.s32 %s209_s6, %s92_s4  ;;  %s106_s13 = sand.u32 7, %s328_s9 }
  0x32   :  { %s210_s14 = sshll.u32 %s103_s1, 5  ;;  %s96_s15 = scalar_lea.vmem [#allocation4], %s95_s7 }
  0x33   :  { %v97_v6 = vld [vmem:[%s96_s15] ss:$8 sm:$0xf]  ;;  %s109_s16 = sadd.s32 %s210_s14, %s106_s13  ;;  %s117_s17 = sshra.s32 %s330_s10, 3 }
  0x34   :  { %99 = vst.msk [vmem:[#allocation7 + $0x4] ss:$8 sm:$0xf] %vm336_vm0, %v97_v6  ;;  %s120_s8 = sand.u32 7, %s330_s10  ;;  %s110_s18 = scalar_lea.vmem [#allocation4], %s109_s16 }
  0x35   :  { %v111_v7 = vld [vmem:[%s110_s18] ss:$8 sm:$0xf]  ;;  %s211_s19 = sshll.u32 %s117_s17, 5  ;;  %s131_s20 = sshra.s32 %s332_s11, 3 }
  0x36   :  { %113 = vst.msk [vmem:[#allocation7 + $0x5] ss:$8 sm:$0xf] %vm336_vm0, %v111_v7  ;;  %s123_s21 = sadd.s32 %s211_s19, %s120_s8  ;;  %s134_s22 = sand.u32 7, %s332_s11 }
  0x37   :  { %s212_s9 = sshll.u32 %s131_s20, 5  ;;  %s124_s23 = scalar_lea.vmem [#allocation4], %s123_s21 }
  0x38   :  { %v125_v8 = vld [vmem:[%s124_s23] ss:$8 sm:$0xf]  ;;  %s137_s24 = sadd.s32 %s212_s9, %s134_s22  ;;  %s250_s10 = scalar_lea.vmem %s150_s12, 512 }
  0x39   :  { %127 = vst.msk [vmem:[#allocation7 + $0x6] ss:$8 sm:$0xf] %vm336_vm0, %v125_v8  ;;  %s138_s25 = scalar_lea.vmem [#allocation4], %s137_s24  ;;  %p251_p11 = scmp.ne.s32.totalorder %s150_s12, %s250_s10 }
  0x3a   :  { %v139_v9 = vld [vmem:[%s138_s25] ss:$8 sm:$0xf]  ;;  %p255_p12 = scmp.lt.s32.totalorder %s150_s12, %s150_s12  ;;  %p256_p13 = scmp.lt.s32.totalorder %s250_s10, %s250_s10 }
  0x3b   :  { %141 = vst.msk [vmem:[#allocation7 + $0x7] ss:$8 sm:$0xf] %vm336_vm0, %v139_v9 }
  0x3c   :  { %p257_p0 = por %p256_p13, %p255_p12 }
  0x3e   :  { %p258_p1 = pnand %p257_p0, %p251_p11 }
  0x40   :  { %261 = shalt.err (!%p258_p1)
}
  0x41   :  { %s262_s27 = scalar_lea.hbm %s383_s2, 512 }
  0x42   :  { %p263_p2 = scmp.ne.s32.totalorder %s383_s2, %s262_s27  ;;  %p266_p3 = scmp.lt.u32.totalorder %s262_s27, %s383_s2 }
  0x44   :  { %p268_p4 = pnand %p266_p3, %p263_p2 }
  0x46   :  { %271 = shalt.err (!%p268_p4)
}
  0x47   :  { %152 = dma.vmem_to_hbm [thread:$0]  %s150_s12, 512, %s383_s2, [#allocation6]  }
  0x48   :  { %276 = dma.done.wait [#allocation6], 512  }
  0x49   :  { %277 = vsyncadd [#allocation6], 4294966784 }
  0x4a   :  { %156 = vsyncpa [#allocation5], 1 }
  0x4b   :  { %157 = vsyncpa [#allocation6], 1 }

</bundles_post_ra>
